<compile_context>
chip_gen: v6e
topology: v6e:2x2x1
jax: 0.10.0
libtpu: 0.0.40
codegen_flags: <defaults>
</compile_context>

<pallas_src>
import functools

import jax
import jax.numpy as jnp
from jax import lax
from jax.experimental import pallas as pl
from jax.experimental.pallas import tpu as pltpu


def _round_up(n: int, m: int) -> int:
    return ((n + m - 1) // m) * m


def discriminator_kernel(xT_ref, w1_ref, b1_ref, w2_ref, b2_ref, o_ref, *, chunk):
    """One lane-dense batch tile, processed in `chunk`-lane sub-chunks.

    xT_ref : [2, TILE_B]  (features on sublanes, batch on lanes)
    w1_ref : [H, 2]       (PyTorch Linear(2, H) weight layout)
    b1_ref : [H, 1]
    w2_ref : [H, 1]       (transposed Linear(H, 1) weight)
    b2_ref : [1]          (SMEM scalar)
    o_ref  : [1, TILE_B]  (lane-dense output)
    """
    # Hoist resident weights out of the chunk loop (tiny, stay in vregs).
    w1c0 = w1_ref[:, 0:1]            # (H, 1)
    w1c1 = w1_ref[:, 1:2]            # (H, 1)
    b1 = b1_ref[...]                 # (H, 1)
    w2 = w2_ref[...]                 # (H, 1)
    b2 = b2_ref[0]                   # scalar

    tile_b = o_ref.shape[-1]
    n_chunks = tile_b // chunk       # static Python int

    def body(c, carry):
        off = pl.multiple_of(c * chunk, chunk)       # 128-aligned lane offset
        x0 = xT_ref[0:1, pl.ds(off, chunk)]          # (1, chunk)
        x1 = xT_ref[1:2, pl.ds(off, chunk)]          # (1, chunk)

        # Layer 1 + ReLU: two broadcast FMAs + max, all on the VPU
        # (K=2 would waste 126/128 of an MXU contraction).
        h = jnp.maximum(w1c0 * x0 + w1c1 * x1 + b1, 0.0)          # (H, chunk)

        # Layer 2: elementwise scale then sublane reduction (XLU) -> (1, chunk).
        z = jnp.sum(h * w2, axis=0, keepdims=True) + b2

        # Exact, overflow-safe sigmoid (clamp keeps exp(-z) finite in f32).
        z = jnp.clip(z, -30.0, 30.0)
        o_ref[:, pl.ds(off, chunk)] = (1.0 / (1.0 + jnp.exp(-z))).astype(o_ref.dtype)
        return carry

    # Chunked inner loop keeps the live vreg set small regardless of tile_b.
    lax.fori_loop(0, n_chunks, body, 0, unroll=True)


def _choose_tiling(B: int, tile_b: int, chunk_b: int):
    """Pick (b_pad, tile, chunk): everything lane-aligned, tile % chunk == 0,
    and >=2 grid steps when the batch allows it (v7x megacore)."""
    b_align = _round_up(max(B, 1), 128)
    chunk = min(chunk_b, b_align)                    # multiple of 128
    tile = min(tile_b, b_align)
    if tile >= b_align and b_align >= 2 * chunk:
        # Whole batch would fit in one step: split so both v7x TCs get work.
        tile = _round_up(pl.cdiv(b_align, 2), chunk)
    tile = _round_up(tile, chunk)
    b_pad = _round_up(b_align, tile)
    return b_pad, tile, chunk


@functools.partial(jax.jit, static_argnames=("tile_b", "chunk_b"))
def discriminator_forward(x, w1_pt, b1_pt, w2_pt, b2_pt, *,
                          tile_b: int = 8192, chunk_b: int = 512):
    """x: [B, 2] f32, PyTorch-layout params -> [B, 1] f32 probabilities."""
    B = x.shape[0]
    H = w1_pt.shape[0]                                   # hidden width (64)

    # Kernel-friendly layouts (one-time wrapper plumbing).
    w1 = w1_pt.astype(jnp.float32)                       # (H, 2)
    b1 = b1_pt.reshape(H, 1).astype(jnp.float32)         # (H, 1)
    w2 = w2_pt.reshape(H, 1).astype(jnp.float32)         # (H, 1) == W2_pt.T
    b2 = b2_pt.reshape(1).astype(jnp.float32)            # (1,)  -> SMEM scalar

    b_pad, tile, chunk = _choose_tiling(B, tile_b, chunk_b)

    # Batch on lanes. Plain transpose + pad (no zeros+scatter).
    # TODO(synk): have the upstream producer emit x as [2, B] to drop this copy.
    xT = x.astype(jnp.float32).T                          # (2, B)
    if b_pad != B:
        xT = jnp.pad(xT, ((0, 0), (0, b_pad - B)))

    grid = (b_pad // tile,)

    cost = pl.CostEstimate(
        flops=b_pad * (7 * H + 8),
        transcendentals=b_pad,
        bytes_accessed=b_pad * 12 + (2 * H + H + H + 1) * 4,
    )

    out = pl.pallas_call(
        functools.partial(discriminator_kernel, chunk=chunk),
        out_shape=jax.ShapeDtypeStruct((1, b_pad), jnp.float32),
        grid=grid,
        in_specs=[
            pl.BlockSpec((2, tile), lambda i: (0, i)),          # x tile (batch on lanes)
            pl.BlockSpec((H, 2), lambda i: (0, 0)),             # w1, resident
            pl.BlockSpec((H, 1), lambda i: (0, 0)),             # b1, resident
            pl.BlockSpec((H, 1), lambda i: (0, 0)),             # w2, resident
            pl.BlockSpec(memory_space=pltpu.MemorySpace.SMEM),  # b2 scalar
        ],
        out_specs=pl.BlockSpec((1, tile), lambda i: (0, i)),    # lane-dense output
        compiler_params=pltpu.CompilerParams(
            dimension_semantics=("parallel",),                  # megacore split on v7x
            # Chunked inner loop keeps VMEM use to ~24*tile bytes, far under
            # every chip's scoped-VMEM default, so no explicit limit is needed.
        ),
        cost_estimate=cost,
    )(xT, w1, b1, w2, b2)

    return out[0, :B].reshape(B, 1)


def init_params(key):
    """PyTorch-shaped params with PyTorch's default U(-1/sqrt(fan_in), ...) init."""
    k1, k2, k3, k4 = jax.random.split(key, 4)
    lim1 = 1.0 / jnp.sqrt(2.0)
    lim2 = 1.0 / jnp.sqrt(64.0)
    w1_pt = jax.random.uniform(k1, (64, 2), jnp.float32, -lim1, lim1)   # Linear(2, 64).weight
    b1_pt = jax.random.uniform(k2, (64,), jnp.float32, -lim1, lim1)     # Linear(2, 64).bias
    w2_pt = jax.random.uniform(k3, (1, 64), jnp.float32, -lim2, lim2)   # Linear(64, 1).weight
    b2_pt = jax.random.uniform(k4, (1,), jnp.float32, -lim2, lim2)      # Linear(64, 1).bias
    return w1_pt, b1_pt, w2_pt, b2_pt


if __name__ == "__main__":
    key = jax.random.PRNGKey(0)
    kx, kp = jax.random.split(key)

    # Non-multiple-of-128 batch: exercises lane padding, a 2-step parallel grid
    # (tile = 1024) and a multi-chunk inner loop.
    B = 2000
    x = jax.random.normal(kx, (B, 2), jnp.float32)
    w1_pt, b1_pt, w2_pt, b2_pt = init_params(kp)

    out = discriminator_forward(x, w1_pt, b1_pt, w2_pt, b2_pt)
    out = jax.block_until_ready(out)

    # Pure-JAX reference with PyTorch semantics: sigmoid(relu(x W1^T + b1) W2^T + b2).
    h_ref = jnp.maximum(x @ w1_pt.T + b1_pt, 0.0)
    ref = 1.0 / (1.0 + jnp.exp(-(h_ref @ w2_pt.T + b2_pt)))

    assert out.shape == (B, 1)
    assert jnp.allclose(out, ref, atol=1e-5, rtol=1e-5), "mismatch vs reference"

    print("KERNEL_OK")
</pallas_src>

<mosaic_0001>
module attributes {stable_mosaic.version = 11 : i64} {
  func.func @discriminator_kernel(%arg0: i32, %arg1: memref<2x1024xf32, #tpu.memory_space<vmem>>, %arg2: memref<64x2xf32, #tpu.memory_space<vmem>>, %arg3: memref<64x1xf32, #tpu.memory_space<vmem>>, %arg4: memref<64x1xf32, #tpu.memory_space<vmem>>, %arg5: memref<1xf32, #tpu.memory_space<smem>>, %arg6: memref<1x1024xf32, #tpu.memory_space<vmem>>) attributes {dimension_semantics = [#tpu.dimension_semantics<parallel>], iteration_bounds = array<i64: 2>, scalar_prefetch = 0 : i64, scratch_operands = 0 : i64, tpu.core_type = #tpu.core_type<tc>, window_params = [{transform_indices = @transform_0, window_bounds = array<i64: 2, 1024>}, {pipeline_mode = #tpu.pipeline_mode<synchronous>, transform_indices = @transform_1, window_bounds = array<i64: 64, 2>}, {pipeline_mode = #tpu.pipeline_mode<synchronous>, transform_indices = @transform_2, window_bounds = array<i64: 64, 1>}, {pipeline_mode = #tpu.pipeline_mode<synchronous>, transform_indices = @transform_3, window_bounds = array<i64: 64, 1>}, {transform_indices = @transform_4, window_bounds = array<i64: 1>}, {transform_indices = @transform_5, window_bounds = array<i64: 1, 1024>}]} {
    %c0 = arith.constant 0 : index
    %c0_0 = arith.constant 0 : index
    %0 = vector.load %arg2[%c0, %c0_0] : memref<64x2xf32, #tpu.memory_space<vmem>>, vector<64x1xf32>
    %c0_1 = arith.constant 0 : index
    %c1 = arith.constant 1 : index
    %1 = vector.load %arg2[%c0_1, %c1] : memref<64x2xf32, #tpu.memory_space<vmem>>, vector<64x1xf32>
    %c0_2 = arith.constant 0 : index
    %c0_3 = arith.constant 0 : index
    %2 = vector.load %arg3[%c0_2, %c0_3] : memref<64x1xf32, #tpu.memory_space<vmem>>, vector<64x1xf32>
    %c0_4 = arith.constant 0 : index
    %c0_5 = arith.constant 0 : index
    %3 = vector.load %arg4[%c0_4, %c0_5] : memref<64x1xf32, #tpu.memory_space<vmem>>, vector<64x1xf32>
    %c0_6 = arith.constant 0 : index
    %4 = memref.load %arg5[%c0_6] : memref<1xf32, #tpu.memory_space<smem>>
    %c0_i32 = arith.constant 0 : i32
    %c512_i32 = arith.constant 512 : i32
    %5 = arith.muli %c0_i32, %c512_i32 : i32
    %6 = tpu.assume_multiple %5, 512 : i32
    %c0_7 = arith.constant 0 : index
    %7 = arith.index_cast %6 : i32 to index
    %8 = vector.load %arg1[%c0_7, %7] : memref<2x1024xf32, #tpu.memory_space<vmem>>, vector<1x512xf32>
    %c1_8 = arith.constant 1 : index
    %9 = arith.index_cast %6 : i32 to index
    %10 = vector.load %arg1[%c1_8, %9] : memref<2x1024xf32, #tpu.memory_space<vmem>>, vector<1x512xf32>
    %11 = vector.broadcast %0 : vector<64x1xf32> to vector<64x512xf32>
    %12 = vector.broadcast %8 : vector<1x512xf32> to vector<64x512xf32>
    %13 = arith.mulf %11, %12 : vector<64x512xf32>
    %14 = vector.broadcast %1 : vector<64x1xf32> to vector<64x512xf32>
    %15 = vector.broadcast %10 : vector<1x512xf32> to vector<64x512xf32>
    %16 = arith.mulf %14, %15 : vector<64x512xf32>
    %17 = arith.addf %13, %16 : vector<64x512xf32>
    %18 = vector.broadcast %2 : vector<64x1xf32> to vector<64x512xf32>
    %19 = arith.addf %17, %18 : vector<64x512xf32>
    %cst = arith.constant 0.000000e+00 : f32
    %20 = vector.broadcast %cst : f32 to vector<64x512xf32>
    %21 = arith.maximumf %19, %20 : vector<64x512xf32>
    %22 = vector.broadcast %3 : vector<64x1xf32> to vector<64x512xf32>
    %23 = arith.mulf %21, %22 : vector<64x512xf32>
    %cst_9 = arith.constant dense<0.000000e+00> : vector<512xf32>
    %24 = vector.multi_reduction <add>, %23, %cst_9 [0] : vector<64x512xf32> to vector<512xf32>
    %25 = vector.shape_cast %24 : vector<512xf32> to vector<1x512xf32>
    %26 = vector.broadcast %4 : f32 to vector<1x512xf32>
    %27 = arith.addf %25, %26 : vector<1x512xf32>
    %cst_10 = arith.constant -3.000000e+01 : f32
    %cst_11 = arith.constant 3.000000e+01 : f32
    %28 = vector.broadcast %cst_10 : f32 to vector<1x512xf32>
    %29 = arith.maximumf %28, %27 : vector<1x512xf32>
    %30 = vector.broadcast %cst_11 : f32 to vector<1x512xf32>
    %31 = arith.minimumf %30, %29 : vector<1x512xf32>
    %cst_12 = arith.constant 0.000000e+00 : f32
    %32 = vector.broadcast %cst_12 : f32 to vector<1x512xf32>
    %33 = arith.subf %32, %31 : vector<1x512xf32>
    %34 = math.exp %33 : vector<1x512xf32>
    %cst_13 = arith.constant 1.000000e+00 : f32
    %35 = vector.broadcast %cst_13 : f32 to vector<1x512xf32>
    %36 = arith.addf %35, %34 : vector<1x512xf32>
    %cst_14 = arith.constant 1.000000e+00 : f32
    %37 = vector.broadcast %cst_14 : f32 to vector<1x512xf32>
    %38 = arith.divf %37, %36 : vector<1x512xf32>
    %c0_15 = arith.constant 0 : index
    %39 = arith.index_cast %6 : i32 to index
    %40 = vector.load %arg6[%c0_15, %39] : memref<1x1024xf32, #tpu.memory_space<vmem>>, vector<1x512xf32>
    tpu.vector_store %arg6[%c0_15, %39], %38 {strides = array<i32>} : memref<1x1024xf32, #tpu.memory_space<vmem>>, vector<1x512xf32>,
    %c1_i32 = arith.constant 1 : i32
    %c512_i32_16 = arith.constant 512 : i32
    %41 = arith.muli %c1_i32, %c512_i32_16 : i32
    %42 = tpu.assume_multiple %41, 512 : i32
    %c0_17 = arith.constant 0 : index
    %43 = arith.index_cast %42 : i32 to index
    %44 = vector.load %arg1[%c0_17, %43] : memref<2x1024xf32, #tpu.memory_space<vmem>>, vector<1x512xf32>
    %c1_18 = arith.constant 1 : index
    %45 = arith.index_cast %42 : i32 to index
    %46 = vector.load %arg1[%c1_18, %45] : memref<2x1024xf32, #tpu.memory_space<vmem>>, vector<1x512xf32>
    %47 = vector.broadcast %0 : vector<64x1xf32> to vector<64x512xf32>
    %48 = vector.broadcast %44 : vector<1x512xf32> to vector<64x512xf32>
    %49 = arith.mulf %47, %48 : vector<64x512xf32>
    %50 = vector.broadcast %1 : vector<64x1xf32> to vector<64x512xf32>
    %51 = vector.broadcast %46 : vector<1x512xf32> to vector<64x512xf32>
    %52 = arith.mulf %50, %51 : vector<64x512xf32>
    %53 = arith.addf %49, %52 : vector<64x512xf32>
    %54 = vector.broadcast %2 : vector<64x1xf32> to vector<64x512xf32>
    %55 = arith.addf %53, %54 : vector<64x512xf32>
    %cst_19 = arith.constant 0.000000e+00 : f32
    %56 = vector.broadcast %cst_19 : f32 to vector<64x512xf32>
    %57 = arith.maximumf %55, %56 : vector<64x512xf32>
    %58 = vector.broadcast %3 : vector<64x1xf32> to vector<64x512xf32>
    %59 = arith.mulf %57, %58 : vector<64x512xf32>
    %cst_20 = arith.constant dense<0.000000e+00> : vector<512xf32>
    %60 = vector.multi_reduction <add>, %59, %cst_20 [0] : vector<64x512xf32> to vector<512xf32>
    %61 = vector.shape_cast %60 : vector<512xf32> to vector<1x512xf32>
    %62 = vector.broadcast %4 : f32 to vector<1x512xf32>
    %63 = arith.addf %61, %62 : vector<1x512xf32>
    %cst_21 = arith.constant -3.000000e+01 : f32
    %cst_22 = arith.constant 3.000000e+01 : f32
    %64 = vector.broadcast %cst_21 : f32 to vector<1x512xf32>
    %65 = arith.maximumf %64, %63 : vector<1x512xf32>
    %66 = vector.broadcast %cst_22 : f32 to vector<1x512xf32>
    %67 = arith.minimumf %66, %65 : vector<1x512xf32>
    %cst_23 = arith.constant 0.000000e+00 : f32
    %68 = vector.broadcast %cst_23 : f32 to vector<1x512xf32>
    %69 = arith.subf %68, %67 : vector<1x512xf32>
    %70 = math.exp %69 : vector<1x512xf32>
    %cst_24 = arith.constant 1.000000e+00 : f32
    %71 = vector.broadcast %cst_24 : f32 to vector<1x512xf32>
    %72 = arith.addf %71, %70 : vector<1x512xf32>
    %cst_25 = arith.constant 1.000000e+00 : f32
    %73 = vector.broadcast %cst_25 : f32 to vector<1x512xf32>
    %74 = arith.divf %73, %72 : vector<1x512xf32>
    %c0_26 = arith.constant 0 : index
    %75 = arith.index_cast %42 : i32 to index
    %76 = vector.load %arg6[%c0_26, %75] : memref<1x1024xf32, #tpu.memory_space<vmem>>, vector<1x512xf32>
    tpu.vector_store %arg6[%c0_26, %75], %74 {strides = array<i32>} : memref<1x1024xf32, #tpu.memory_space<vmem>>, vector<1x512xf32>,
    %c2_i32 = arith.constant 2 : i32
    return
  }
  func.func @transform_0(%arg0: i32) -> (i32, i32) {
    %c0_i32 = arith.constant 0 : i32
    %c0_i32_0 = arith.constant 0 : i32
    return %c0_i32, %arg0 : i32, i32
  }
  func.func @transform_1(%arg0: i32) -> (i32, i32) {
    %c0_i32 = arith.constant 0 : i32
    %c0_i32_0 = arith.constant 0 : i32
    %c0_i32_1 = arith.constant 0 : i32
    return %c0_i32, %c0_i32_0 : i32, i32
  }
  func.func @transform_2(%arg0: i32) -> (i32, i32) {
    %c0_i32 = arith.constant 0 : i32
    %c0_i32_0 = arith.constant 0 : i32
    %c0_i32_1 = arith.constant 0 : i32
    return %c0_i32, %c0_i32_0 : i32, i32
  }
  func.func @transform_3(%arg0: i32) -> (i32, i32) {
    %c0_i32 = arith.constant 0 : i32
    %c0_i32_0 = arith.constant 0 : i32
    %c0_i32_1 = arith.constant 0 : i32
    return %c0_i32, %c0_i32_0 : i32, i32
  }
  func.func @transform_4(%arg0: i32) -> i32 {
    %c0_i32 = arith.constant 0 : i32
    %c0_i32_0 = arith.constant 0 : i32
    return %c0_i32 : i32
  }
  func.func @transform_5(%arg0: i32) -> (i32, i32) {
    %c0_i32 = arith.constant 0 : i32
    %c0_i32_0 = arith.constant 0 : i32
    return %c0_i32, %arg0 : i32, i32
  }
}

</mosaic_0001>

<bundles_post_ra>
// kernel: discriminator_forward.1
= control target key start
LH: loop header
LB: loop body
LE: loop exit
PB: predicated region body
PF: predicated region fallthrough
CT: control target
= control target key end

     0   :  { %s1291_s20 = smov 0   ;;  %s2199_s0 = inlined_call_operand.vmem [shape: f32[2,2048], index: 0, kind: input, shape index: {}]   ;;  %s2200_s1 = inlined_call_operand.vmem [shape: f32[64,2], index: 1, kind: input, shape index: {}]   ;;  %s2201_s2 = inlined_call_operand.vmem [shape: f32[64,1], index: 2, kind: input, shape index: {}]   ;;  %s2202_s3 = inlined_call_operand.vmem [shape: f32[64,1], index: 3, kind: input, shape index: {}]   ;;  %s2203_s4 = inlined_call_operand.<no memory space> [shape: f32[1], index: 4, kind: input, shape index: {}]   ;;  %s2204_s5 = inlined_call_operand.vmem [shape: f32[1,2048], index: 5, kind: output, shape index: {}]  }
   0x1   :  { %10 = sst [smem:[#allocation2]] %s2203_s4 }
   0x2 LB: > { %s1172_s21 = sadd.s32 4294967295, %s1253_s20   ;;  %p1176_p0 = scmp.ge.s32.totalorder %s1253_s20, 1  ;;  %s1253_s20 = sphi %s1291_s20, %s16_s20  }
   0x3   : > { %p189_p1 = scmp.lt.s32.totalorder %s1253_s20, 3 }
   0x5   : > { %p190_p2 = pnand %p1176_p0, %p189_p1 }
   0x7   : > { %193 = sbr.rel (%p190_p2) target bundleno = 323 (0x143), region = 40 }
   0xc   : > { %v232_v0 = vld [vmem:[%s2200_s1 + $0x28] sm:$0xff]  ;;  %v227_v1 = vld [vmem:[%s2200_s1] sm:$0xff]  ;;  %v1255_v2 = vmov 1   ;;  %v1256_v4 = vmov 0   ;;  %v229_v5 = vld [vmem:[%s2200_s1 + $0x10] sm:$0xff]  ;;  %s1177_s22 = sshll.u32 %s1172_s21, 3  ;;  %v2205_v26 = vlaneseq }
   0xd   : > { %1209 = vset.pattern.permute.xlu0 %v1255_v2  ;;  %1205 = vset.pattern.permute.xlu1 %v1255_v2  ;;  %v228_v3 = vld [vmem:[%s2200_s1 + $0x8] sm:$0xff]  ;;  %v230_v6 = vld [vmem:[%s2200_s1 + $0x18] sm:$0xff]  ;;  %v235_v8 = vld [vmem:[%s2201_s2] sm:$0xff]  ;;  %p217_p3 = scmp.lt.s32.totalorder %s1177_s22, 15  ;;  %s251_s26 = sld [smem:[#allocation2]] }
   0xe   : > { %369 = vperm.xlu0 %1209, %v232_v0   ;;  %349 = vperm.xlu1 %1205, %v227_v1   ;;  %v236_v7 = vld [vmem:[%s2201_s2 + $0x8] sm:$0xff]  ;;  %v231_v9 = vld [vmem:[%s2200_s1 + $0x20] sm:$0xff]  ;;  %v237_v10 = vld [vmem:[%s2201_s2 + $0x10] sm:$0xff]  ;;  %v1377_v27 = vshrl.u32 %v2205_v26, 7 }
   0xf   : > { %v238_v11 = vld [vmem:[%s2201_s2 + $0x18] sm:$0xff]  ;;  %v244_v12 = vld [vmem:[%s2202_s3 + $0x8] sm:$0xff]  ;;  %v243_v13 = vld [vmem:[%s2202_s3] sm:$0xff]  ;;  %s2465_s22 = smov (!%p217_p3, %s1177_s22), 15 }
  0x10   : > { %v239_v14 = vld [vmem:[%s2201_s2 + $0x20] sm:$0xff]  ;;  %v233_v15 = vld [vmem:[%s2200_s1 + $0x30] sm:$0xff]  ;;  %v234_v16 = vld [vmem:[%s2200_s1 + $0x38] sm:$0xff]  ;;  %s1178_s23 = sshll.u32 %s2465_s22, 1  ;;  %2251 = vst [vmem:[#allocation3_spill] sm:$0xff] %v1377_v27  ;;  %v298_v28 = vsub.s32 0, %v1377_v27  ;;  %s225_s28 = scalar_lea.vmem %s2204_s5, %s2465_s22 }
  0x11   : > { %v240_v17 = vld [vmem:[%s2201_s2 + $0x28] sm:$0xff]  ;;  %v241_v18 = vld [vmem:[%s2201_s2 + $0x30] sm:$0xff]  ;;  %v242_v20 = vld [vmem:[%s2201_s2 + $0x38] sm:$0xff]  ;;  %s220_s25 = scalar_lea.vmem %s2199_s0, %s1178_s23  ;;  %v302_v29 = vsub.s32 1, %v1377_v27  ;;  %v306_v30 = vsub.s32 2, %v1377_v27  ;;  %v310_v31 = vsub.s32 3, %v1377_v27 }
  0x12   : > { %1210 = vset.pattern.permute.xlu0 %v1256_v4  ;;  %353 = vperm.xlu1 %1205, %v228_v3   ;;  %v245_v19 = vld [vmem:[%s2202_s3 + $0x10] sm:$0xff]  ;;  %v246_v22 = vld [vmem:[%s2202_s3 + $0x18] sm:$0xff]  ;;  %v247_v23 = vld [vmem:[%s2202_s3 + $0x20] sm:$0xff] }
  0x13   : > { %257 = vperm.xlu0 %1210, %v227_v1   ;;  %v249_v21 = vld [vmem:[%s2202_s3 + $0x30] sm:$0xff]  ;;  %v248_v24 = vld [vmem:[%s2202_s3 + $0x28] sm:$0xff]  ;;  %v250_v25 = vld [vmem:[%s2202_s3 + $0x38] sm:$0xff]  ;;  %v1418_v54 = vstv %s251_s26 }
  0x14   : > { %v1180_v32 = vld [vmem:[%s220_s25 + $0x1] ss:$2 sm:$0xf]  ;;  %v1186_v33 = vld [vmem:[%s220_s25 + $0x9] ss:$2 sm:$0xf] }
  0x15   : > { %v252_v34 = vld [vmem:[%s220_s25] ss:$2 sm:$0xf]  ;;  %v1386_v35 = vrot.slane %v1180_v32, %v298_v28  ;;  %v1185_v36 = vld [vmem:[%s220_s25 + $0x8] ss:$2 sm:$0xf]  ;;  %v1388_v37 = vrot.slane %v1180_v32, %v302_v29  ;;  %v1390_v38 = vrot.slane %v1180_v32, %v306_v30  ;;  %v1392_v39 = vrot.slane %v1180_v32, %v310_v31 }
  0x16   : > { %357 = vperm.xlu1 %1205, %v229_v5   ;;  %v1394_v40 = vrot.slane %v1186_v33, %v298_v28  ;;  %v1396_v41 = vrot.slane %v1186_v33, %v302_v29  ;;  %v1398_v42 = vrot.slane %v1186_v33, %v306_v30  ;;  %v1400_v43 = vrot.slane %v1186_v33, %v310_v31 }
  0x17   : > { %262 = vperm.xlu0 %1210, %v228_v3   ;;  %2252 = vst [vmem:[#allocation4_spill] sm:$0xff] %v1386_v35  ;;  %2253 = vst [vmem:[#allocation5_spill] sm:$0xff] %v1388_v37  ;;  %v1402_v44 = vrot.slane %v252_v34, %v298_v28  ;;  %v1404_v45 = vrot.slane %v252_v34, %v302_v29  ;;  %v1406_v46 = vrot.slane %v252_v34, %v306_v30 }
  0x18   : > { %2254 = vst [vmem:[#allocation6_spill] sm:$0xff] %v1390_v38  ;;  %2255 = vst [vmem:[#allocation7_spill] sm:$0xff] %v1392_v39  ;;  %v1408_v47 = vrot.slane %v252_v34, %v310_v31  ;;  %v1410_v48 = vrot.slane %v1185_v36, %v298_v28  ;;  %v1412_v51 = vrot.slane %v1185_v36, %v302_v29 }
  0x19   : > { %2256 = vst [vmem:[#allocation8_spill] sm:$0xff] %v1394_v40  ;;  %2257 = vst [vmem:[#allocation9_spill] sm:$0xff] %v1396_v41  ;;  %v1414_v52 = vrot.slane %v1185_v36, %v306_v30  ;;  %v1416_v53 = vrot.slane %v1185_v36, %v310_v31 }
  0x1a   : > { %361 = vperm.xlu1 %1205, %v230_v6   ;;  %2258 = vst [vmem:[#allocation10_spill] sm:$0xff] %v1398_v42  ;;  %2259 = vst [vmem:[#allocation11_spill] sm:$0xff] %v1400_v43 }
  0x1b   : > { %267 = vperm.xlu0 %1210, %v229_v5   ;;  %2260 = vst [vmem:[#allocation12_spill] sm:$0xff] %v1412_v51  ;;  %2261 = vst [vmem:[#allocation13_spill] sm:$0xff] %v1414_v52 }
  0x1c   : > { %2262 = vst [vmem:[#allocation14_spill] sm:$0xff] %v1416_v53  ;;  %2263 = vst [vmem:[#allocation15_spill] sm:$0xff] %v1418_v54 }
  0x1e   : > { %1206 = vset.pattern.permute.xlu1 %v1256_v4 }
  0x1f   : > { %272 = vperm.xlu0 %1210, %v230_v6   ;;  %472 = vperm.xlu1 %1206, %v236_v7  }
  0x23   : > { %467 = vperm.xlu0 %1210, %v235_v8   ;;  %1207 = vset.pattern.permute.xlu1 %v1255_v2 }
  0x24   : > { %365 = vperm.xlu1 %1207, %v231_v9  }
  0x27   : > { %277 = vperm.xlu0 %1210, %v231_v9  }
  0x28   : > { %1208 = vset.pattern.permute.xlu1 %v1256_v4 }
  0x29   : > { %282 = vperm.xlu1 %1208, %v232_v0  }
  0x2b   : > { %477 = vperm.xlu0 %1210, %v237_v10  }
  0x2d   : > { %482 = vperm.xlu1 %1208, %v238_v11  }
  0x2f   : > { %576 = vperm.xlu0 %1210, %v244_v12  }
  0x31   : > { %571 = vperm.xlu1 %1208, %v243_v13  }
  0x33   : > { %487 = vperm.xlu0 %1210, %v239_v14  }
  0x35   : > { %287 = vperm.xlu1 %1208, %v233_v15  }
  0x37   : > { %292 = vperm.xlu0 %1210, %v234_v16  }
  0x39   : > { %1211 = vset.pattern.permute.xlu1 %v1255_v2 }
  0x3a   : > { %373 = vperm.xlu1 %1211, %v233_v15  }
  0x3b   : > { %492 = vperm.xlu0 %1210, %v240_v17  }
  0x3e   : > { %1212 = vset.pattern.permute.xlu1 %v1256_v4 }
  0x3f   : > { %497 = vperm.xlu0 %1210, %v241_v18   ;;  %581 = vperm.xlu1 %1212, %v245_v19  }
  0x43   : > { %502 = vperm.xlu0 %1210, %v242_v20   ;;  %1213 = vset.pattern.permute.xlu1 %v1255_v2 }
  0x44   : > { %377 = vperm.xlu1 %1213, %v234_v16  }
  0x47   : > { %601 = vperm.xlu0 %1210, %v249_v21  }
  0x48   : > { %1214 = vset.pattern.permute.xlu1 %v1256_v4 }
  0x49   : > { %586 = vperm.xlu1 %1214, %v246_v22  }
  0x4d   : > { %591 = vperm.xlu1 %1214, %v247_v23  }
  0x51   : > { %596 = vperm.xlu1 %1214, %v248_v24  }
  0x55   : > { %606 = vperm.xlu1 %1214, %v250_v25  }
  0x89   : > { %v350_v49 = vpop.permute.xlu1 %349  ;;  %v370_v50 = vpop.permute.xlu0 %369 }
  0x8a   : > { %v1421_v55 = vmul.f32 %v1386_v35, %v350_v49  ;;  %v1424_v56 = vmul.f32 %v1388_v37, %v350_v49  ;;  %v1427_v57 = vmul.f32 %v1390_v38, %v350_v49  ;;  %v1430_v58 = vmul.f32 %v1392_v39, %v350_v49 }
  0x8b   : > { %v1433_v59 = vmul.f32 %v1394_v40, %v350_v49  ;;  %v1436_v60 = vmul.f32 %v1396_v41, %v350_v49  ;;  %v1439_v61 = vmul.f32 %v1398_v42, %v350_v49  ;;  %v1442_v62 = vmul.f32 %v1400_v43, %v350_v49 }
  0x8c   : > { %v1445_v63 = vmul.f32 %v1386_v35, %v370_v50  ;;  %v1448_v0 = vmul.f32 %v1388_v37, %v370_v50  ;;  %v1451_v1 = vmul.f32 %v1390_v38, %v370_v50  ;;  %v1454_v2 = vmul.f32 %v1392_v39, %v370_v50 }
  0x8d   : > { %v1457_v3 = vmul.f32 %v1394_v40, %v370_v50  ;;  %v1460_v4 = vmul.f32 %v1396_v41, %v370_v50  ;;  %v1463_v5 = vmul.f32 %v1398_v42, %v370_v50  ;;  %v1466_v6 = vmul.f32 %v1400_v43, %v370_v50  ;;  %v354_v7 = vpop.permute.xlu1 %353 }
  0x8e   : > { %2264 = vst [vmem:[#allocation16_spill] sm:$0xff] %v1445_v63  ;;  %2265 = vst [vmem:[#allocation17_spill] sm:$0xff] %v1448_v0  ;;  %v405_v8 = vmul.f32 %v1386_v35, %v354_v7  ;;  %v406_v9 = vmul.f32 %v1388_v37, %v354_v7  ;;  %v407_v10 = vmul.f32 %v1390_v38, %v354_v7  ;;  %v258_v12 = vpop.permute.xlu0 %257 }
  0x8f   : > { %2266 = vst [vmem:[#allocation18_spill] sm:$0xff] %v1451_v1  ;;  %2267 = vst [vmem:[#allocation19_spill] sm:$0xff] %v1454_v2  ;;  %v408_v11 = vmul.f32 %v1392_v39, %v354_v7  ;;  %v1473_v13 = vmul.f32 %v1394_v40, %v354_v7  ;;  %v1476_v14 = vmul.f32 %v1396_v41, %v354_v7 }
  0x90   : > { %2268 = vst [vmem:[#allocation20_spill] sm:$0xff] %v1457_v3  ;;  %2269 = vst [vmem:[#allocation21_spill] sm:$0xff] %v1460_v4  ;;  %v1479_v15 = vmul.f32 %v1398_v42, %v354_v7  ;;  %v1482_v16 = vmul.f32 %v1400_v43, %v354_v7  ;;  %v1485_v17 = vmul.f32 %v1402_v44, %v258_v12 }
  0x91   : > { %2270 = vst [vmem:[#allocation22_spill] sm:$0xff] %v1463_v5  ;;  %2271 = vst [vmem:[#allocation23_spill] sm:$0xff] %v1466_v6  ;;  %v1488_v18 = vmul.f32 %v1404_v45, %v258_v12  ;;  %v1491_v19 = vmul.f32 %v1406_v46, %v258_v12  ;;  %v1494_v20 = vmul.f32 %v1408_v47, %v258_v12  ;;  %v358_v25 = vpop.permute.xlu1 %357 }
  0x92   : > { %v1497_v21 = vmul.f32 %v1410_v48, %v258_v12  ;;  %v1500_v22 = vmul.f32 %v1412_v51, %v258_v12  ;;  %v1503_v23 = vmul.f32 %v1414_v52, %v258_v12  ;;  %v1506_v24 = vmul.f32 %v1416_v53, %v258_v12  ;;  %v263_v32 = vpop.permute.xlu0 %262 }
  0x93   : > { %v1509_v28 = vmul.f32 %v1386_v35, %v358_v25  ;;  %v1512_v29 = vmul.f32 %v1388_v37, %v358_v25  ;;  %v1515_v30 = vmul.f32 %v1390_v38, %v358_v25  ;;  %v1518_v31 = vmul.f32 %v1392_v39, %v358_v25 }
  0x94   : > { %v1521_v33 = vmul.f32 %v1394_v40, %v358_v25  ;;  %v1524_v34 = vmul.f32 %v1396_v41, %v358_v25  ;;  %v1527_v36 = vmul.f32 %v1398_v42, %v358_v25  ;;  %v1530_v49 = vmul.f32 %v1400_v43, %v358_v25 }
  0x95   : > { %2272 = vst [vmem:[#allocation24_spill] sm:$0xff] %v1515_v30  ;;  %2273 = vst [vmem:[#allocation25_spill] sm:$0xff] %v1518_v31  ;;  %v320_v50 = vmul.f32 %v1402_v44, %v263_v32  ;;  %v321_v7 = vmul.f32 %v1404_v45, %v263_v32  ;;  %v322_v12 = vmul.f32 %v1406_v46, %v263_v32  ;;  %v362_v4 = vpop.permute.xlu1 %361 }
  0x96   : > { %2274 = vst [vmem:[#allocation26_spill] sm:$0xff] %v1521_v33  ;;  %2275 = vst [vmem:[#allocation27_spill] sm:$0xff] %v1524_v34  ;;  %v323_v26 = vmul.f32 %v1408_v47, %v263_v32  ;;  %v793_v27 = vmul.f32 %v1410_v48, %v263_v32  ;;  %v794_v54 = vmul.f32 %v1412_v51, %v263_v32  ;;  %v268_v0 = vpop.permute.xlu0 %267 }
  0x97   : > { %2276 = vst [vmem:[#allocation28_spill] sm:$0xff] %v1527_v36  ;;  %2277 = vst [vmem:[#allocation29_spill] sm:$0xff] %v1530_v49  ;;  %v795_v6 = vmul.f32 %v1414_v52, %v263_v32  ;;  %v796_v5 = vmul.f32 %v1416_v53, %v263_v32  ;;  %v1541_v25 = vmul.f32 %v1386_v35, %v362_v4 }
  0x98   : > { %v1544_v3 = vmul.f32 %v1388_v37, %v362_v4  ;;  %v1547_v2 = vmul.f32 %v1390_v38, %v362_v4  ;;  %v1550_v1 = vmul.f32 %v1392_v39, %v362_v4  ;;  %v1553_v63 = vmul.f32 %v1394_v40, %v362_v4 }
  0x99   : > { %2278 = vst [vmem:[#allocation30_spill] sm:$0xff] %v1541_v25  ;;  %v1556_v49 = vmul.f32 %v1396_v41, %v362_v4  ;;  %v1559_v32 = vmul.f32 %v1398_v42, %v362_v4  ;;  %v1562_v25 = vmul.f32 %v1400_v43, %v362_v4  ;;  %v1583_v4 = vmul.f32 %v1414_v52, %v268_v0 }
  0x9a   : > { %2279 = vst [vmem:[#allocation31_spill] sm:$0xff] %v1544_v3  ;;  %2280 = vst [vmem:[#allocation32_spill] sm:$0xff] %v1547_v2  ;;  %v1565_v3 = vmul.f32 %v1402_v44, %v268_v0  ;;  %v1568_v2 = vmul.f32 %v1404_v45, %v268_v0  ;;  %v273_v36 = vpop.permute.xlu0 %272  ;;  %v473_v34 = vpop.permute.xlu1 %472  ;;  %v437_v33 = vadd.f32 %v405_v8, %v320_v50 }
  0x9b   : > { %2281 = vst [vmem:[#allocation33_spill] sm:$0xff] %v1550_v1  ;;  %2282 = vst [vmem:[#allocation34_spill] sm:$0xff] %v1553_v63  ;;  %v1571_v1 = vmul.f32 %v1406_v46, %v268_v0  ;;  %v1574_v63 = vmul.f32 %v1408_v47, %v268_v0  ;;  %v438_v31 = vadd.f32 %v406_v9, %v321_v7 }
  0x9c   : > { %2283 = vst [vmem:[#allocation35_spill] sm:$0xff] %v1556_v49  ;;  %2284 = vst [vmem:[#allocation36_spill] sm:$0xff] %v1559_v32  ;;  %v1577_v49 = vmul.f32 %v1410_v48, %v268_v0  ;;  %v1580_v32 = vmul.f32 %v1412_v51, %v268_v0  ;;  %v439_v30 = vadd.f32 %v407_v10, %v322_v12 }
  0x9d   : > { %2285 = vst [vmem:[#allocation37_spill] sm:$0xff] %v1562_v25  ;;  %2286 = vst [vmem:[#allocation38_spill] sm:$0xff] %v1571_v1  ;;  %v1586_v25 = vmul.f32 %v1416_v53, %v268_v0  ;;  %v440_v1 = vadd.f32 %v408_v11, %v323_v26  ;;  %v1601_v0 = vmul.f32 %v1410_v48, %v273_v36 }
  0x9e   : > { %2287 = vst [vmem:[#allocation39_spill] sm:$0xff] %v1574_v63  ;;  %2288 = vst [vmem:[#allocation40_spill] sm:$0xff] %v1577_v49  ;;  %v1589_v63 = vmul.f32 %v1402_v44, %v273_v36  ;;  %v1592_v49 = vmul.f32 %v1404_v45, %v273_v36  ;;  %v1604_v8 = vmul.f32 %v1412_v51, %v273_v36 }
  0x9f   : > { %2289 = vst [vmem:[#allocation41_spill] sm:$0xff] %v1580_v32  ;;  %2290 = vst [vmem:[#allocation42_spill] sm:$0xff] %v1583_v4  ;;  %v1595_v32 = vmul.f32 %v1406_v46, %v273_v36  ;;  %v1598_v4 = vmul.f32 %v1408_v47, %v273_v36  ;;  %v1607_v26 = vmul.f32 %v1414_v52, %v273_v36 }
  0xa0   : > { %2292 = vst [vmem:[#allocation44_spill] sm:$0xff] %v1601_v0  ;;  %2293 = vst [vmem:[#allocation45_spill] sm:$0xff] %v1604_v8  ;;  %v1610_v9 = vmul.f32 %v1416_v53, %v273_v36  ;;  %v1612_v10 = vadd.f32 %v473_v34, %v437_v33  ;;  %v1614_v11 = vadd.f32 %v473_v34, %v438_v31 }
  0xa1   : > { %2291 = vst [vmem:[#allocation43_spill] sm:$0xff] %v1598_v4  ;;  %2294 = vst [vmem:[#allocation46_spill] sm:$0xff] %v1607_v26  ;;  %v1616_v50 = vadd.f32 %v473_v34, %v439_v30  ;;  %v1618_v7 = vadd.f32 %v473_v34, %v440_v1  ;;  %v878_v12 = vadd.f32 %v1473_v13, %v793_v27 }
  0xa2   : > { %2295 = vst [vmem:[#allocation47_spill] sm:$0xff] %v1610_v9  ;;  %v879_v0 = vadd.f32 %v1476_v14, %v794_v54  ;;  %v880_v8 = vadd.f32 %v1479_v15, %v795_v6  ;;  %v881_v4 = vadd.f32 %v1482_v16, %v796_v5  ;;  %v468_v54 = vpop.permute.xlu0 %467  ;;  %v433_v5 = vadd.f32 %v1421_v55, %v1485_v17 }
  0xa3   : > { %v1628_v30 = vadd.f32 %v878_v12, %v473_v34  ;;  %v434_v6 = vadd.f32 %v1424_v56, %v1488_v18  ;;  %v435_v13 = vadd.f32 %v1427_v57, %v1491_v19  ;;  %v436_v14 = vadd.f32 %v1430_v58, %v1494_v20  ;;  %v366_v57 = vpop.permute.xlu1 %365 }
  0xa4   : > { %v1630_v1 = vadd.f32 %v879_v0, %v473_v34  ;;  %v1632_v9 = vadd.f32 %v880_v8, %v473_v34  ;;  %v1634_v27 = vadd.f32 %v881_v4, %v473_v34  ;;  %v1648_v0 = vadd.f32 %v468_v54, %v433_v5 }
  0xa5   : > { %v1650_v55 = vadd.f32 %v468_v54, %v434_v6  ;;  %v1652_v17 = vadd.f32 %v468_v54, %v435_v13  ;;  %v1654_v56 = vadd.f32 %v468_v54, %v436_v14  ;;  %v874_v58 = vadd.f32 %v1433_v59, %v1497_v21 }
  0xa6   : > { %v875_v18 = vadd.f32 %v1436_v60, %v1500_v22  ;;  %v876_v19 = vadd.f32 %v1439_v61, %v1503_v23  ;;  %v877_v20 = vadd.f32 %v1442_v62, %v1506_v24  ;;  %v1677_v61 = vmul.f32 %v1386_v35, %v366_v57  ;;  %v278_v24 = vpop.permute.xlu0 %277  ;;  %v2311_v35 = vld [vmem:[#allocation27_spill] sm:$0xff] }
  0xa7   : > { %v1668_v13 = vadd.f32 %v874_v58, %v468_v54  ;;  %v1680_v62 = vmul.f32 %v1388_v37, %v366_v57  ;;  %v1683_v22 = vmul.f32 %v1390_v38, %v366_v57  ;;  %v1686_v23 = vmul.f32 %v1392_v39, %v366_v57  ;;  %v283_v12 = vpop.permute.xlu1 %282  ;;  %v2309_v38 = vld [vmem:[#allocation26_spill] sm:$0xff] }
  0xa8   : > { %v1670_v59 = vadd.f32 %v875_v18, %v468_v54  ;;  %v1672_v21 = vadd.f32 %v876_v19, %v468_v54  ;;  %v1674_v60 = vadd.f32 %v877_v20, %v468_v54  ;;  %v1693_v19 = vmul.f32 %v1394_v40, %v366_v57  ;;  %v2307_v40 = vld [vmem:[#allocation25_spill] sm:$0xff] }
  0xa9   : > { %v1696_v20 = vmul.f32 %v1396_v41, %v366_v57  ;;  %v1699_v6 = vmul.f32 %v1398_v42, %v366_v57  ;;  %v1702_v5 = vmul.f32 %v1400_v43, %v366_v57  ;;  %v1705_v14 = vmul.f32 %v1402_v44, %v278_v24  ;;  %v2305_v42 = vld [vmem:[#allocation24_spill] sm:$0xff] }
  0xaa   : > { %v1708_v54 = vmul.f32 %v1404_v45, %v278_v24  ;;  %v1711_v18 = vmul.f32 %v1406_v46, %v278_v24  ;;  %v1714_v58 = vmul.f32 %v1408_v47, %v278_v24  ;;  %v1717_v8 = vmul.f32 %v1410_v48, %v278_v24  ;;  %v478_v43 = vpop.permute.xlu0 %477 }
  0xab   : > { %v1720_v4 = vmul.f32 %v1412_v51, %v278_v24  ;;  %v1723_v57 = vmul.f32 %v1414_v52, %v278_v24  ;;  %v1726_v34 = vmul.f32 %v1416_v53, %v278_v24  ;;  %v1729_v16 = vmul.f32 %v1402_v44, %v283_v12 }
  0xac   : > { %v1732_v15 = vmul.f32 %v1404_v45, %v283_v12  ;;  %v1735_v31 = vmul.f32 %v1406_v46, %v283_v12  ;;  %v1738_v33 = vmul.f32 %v1408_v47, %v283_v12  ;;  %v1741_v36 = vmul.f32 %v1410_v48, %v283_v12 }
  0xad   : > { %2296 = vst [vmem:[#allocation48_spill] sm:$0xff] %v1729_v16  ;;  %v1744_v26 = vmul.f32 %v1412_v51, %v283_v12  ;;  %v1747_v24 = vmul.f32 %v1414_v52, %v283_v12  ;;  %v1750_v16 = vmul.f32 %v1416_v53, %v283_v12  ;;  %v2313_v53 = vld [vmem:[#allocation28_spill] sm:$0xff] }
  0xae   : > { %2297 = vst [vmem:[#allocation49_spill] sm:$0xff] %v1732_v15  ;;  %2298 = vst [vmem:[#allocation50_spill] sm:$0xff] %v1735_v31  ;;  %v441_v15 = vadd.f32 %v1509_v28, %v1565_v3  ;;  %v442_v31 = vadd.f32 %v1512_v29, %v1568_v2  ;;  %v2314_v3 = vld [vmem:[#allocation29_spill] sm:$0xff] }
  0xaf   : > { %2299 = vst [vmem:[#allocation51_spill] sm:$0xff] %v1738_v33  ;;  %2300 = vst [vmem:[#allocation52_spill] sm:$0xff] %v1741_v36  ;;  %v2304_v33 = vld [vmem:[#allocation38_spill] sm:$0xff]  ;;  %v2306_v36 = vld [vmem:[#allocation39_spill] sm:$0xff]  ;;  %v885_v28 = vadd.f32 %v2314_v3, %v1586_v25 }
  0xb0   : > { %2301 = vst [vmem:[#allocation53_spill] sm:$0xff] %v1744_v26  ;;  %2302 = vst [vmem:[#allocation54_spill] sm:$0xff] %v1747_v24  ;;  %v443_v41 = vadd.f32 %v2305_v42, %v2304_v33  ;;  %v444_v39 = vadd.f32 %v2307_v40, %v2306_v36  ;;  %v2308_v26 = vld [vmem:[#allocation40_spill] sm:$0xff]  ;;  %v2310_v24 = vld [vmem:[#allocation41_spill] sm:$0xff]  ;;  %v1768_v51 = vadd.f32 %v478_v43, %v441_v15 }
  0xb1   : > { %2303 = vst [vmem:[#allocation55_spill] sm:$0xff] %v1750_v16  ;;  %v882_v37 = vadd.f32 %v2309_v38, %v2308_v26  ;;  %v883_v12 = vadd.f32 %v2311_v35, %v2310_v24  ;;  %v2312_v16 = vld [vmem:[#allocation42_spill] sm:$0xff]  ;;  %v1770_v2 = vadd.f32 %v478_v43, %v442_v31  ;;  %v1782_v35 = vadd.f32 %v885_v28, %v478_v43  ;;  %v2323_v28 = vld [vmem:[#allocation43_spill] sm:$0xff]  ;;  %v2324_v33 = vld [vmem:[#allocation33_spill] sm:$0xff] }
  0xb2   : > { %v884_v52 = vadd.f32 %v2313_v53, %v2312_v16  ;;  %v1772_v42 = vadd.f32 %v478_v43, %v443_v41  ;;  %v1774_v29 = vadd.f32 %v478_v43, %v444_v39  ;;  %v2321_v16 = vld [vmem:[#allocation31_spill] sm:$0xff]  ;;  %v448_v36 = vadd.f32 %v2324_v33, %v2323_v28  ;;  %v2325_v41 = vld [vmem:[#allocation44_spill] sm:$0xff]  ;;  %v2326_v25 = vld [vmem:[#allocation34_spill] sm:$0xff] }
  0xb3   : > { %v1776_v40 = vadd.f32 %v882_v37, %v478_v43  ;;  %v1778_v38 = vadd.f32 %v883_v12, %v478_v43  ;;  %2319 = vst [vmem:[#allocation40_spill] sm:$0xff] %v1782_v35  ;;  %v446_v24 = vadd.f32 %v2321_v16, %v1592_v49  ;;  %v2322_v12 = vld [vmem:[#allocation32_spill] sm:$0xff]  ;;  %v886_v39 = vadd.f32 %v2326_v25, %v2325_v41  ;;  %v2327_v53 = vld [vmem:[#allocation45_spill] sm:$0xff]  ;;  %v2328_v37 = vld [vmem:[#allocation35_spill] sm:$0xff] }
  0xb4   : > { %2315 = vst [vmem:[#allocation38_spill] sm:$0xff] %v1774_v29  ;;  %v1780_v26 = vadd.f32 %v884_v52, %v478_v43  ;;  %v483_v52 = vpop.permute.xlu1 %482  ;;  %v2320_v43 = vld [vmem:[#allocation30_spill] sm:$0xff]  ;;  %v447_v3 = vadd.f32 %v2322_v12, %v1595_v32  ;;  %v2330_v35 = vld [vmem:[#allocation36_spill] sm:$0xff] }
  0xb5   : > { %2316 = vst [vmem:[#allocation24_spill] sm:$0xff] %v1776_v40  ;;  %2317 = vst [vmem:[#allocation39_spill] sm:$0xff] %v1778_v38  ;;  %v445_v15 = vadd.f32 %v2320_v43, %v1589_v63  ;;  %v2329_v31 = vld [vmem:[#allocation46_spill] sm:$0xff]  ;;  %v2331_v40 = vld [vmem:[#allocation47_spill] sm:$0xff]  ;;  %v1810_v49 = vadd.f32 %v483_v52, %v446_v24  ;;  %v1814_v16 = vadd.f32 %v483_v52, %v448_v36  ;;  %v2340_v36 = vmax.f32 %v1628_v30, 0.0 }
  0xb6   : > { %2318 = vst [vmem:[#allocation25_spill] sm:$0xff] %v1780_v26  ;;  %v887_v26 = vadd.f32 %v2328_v37, %v2327_v53  ;;  %v888_v38 = vadd.f32 %v2330_v35, %v2329_v31  ;;  %v2332_v63 = vld [vmem:[#allocation37_spill] sm:$0xff]  ;;  %v1812_v32 = vadd.f32 %v483_v52, %v447_v3  ;;  %v1816_v33 = vadd.f32 %v886_v39, %v483_v52  ;;  %v577_v35 = vpop.permute.xlu0 %576 }
  0xb7   : > { %v889_v43 = vadd.f32 %v2332_v63, %v2331_v40  ;;  %v1808_v29 = vadd.f32 %v483_v52, %v445_v15  ;;  %v2337_v3 = vmax.f32 %v1614_v11, 0.0  ;;  %v2338_v63 = vmax.f32 %v1616_v50, 0.0 }
  0xb8   : > { %v1818_v25 = vadd.f32 %v887_v26, %v483_v52  ;;  %v1820_v41 = vadd.f32 %v888_v38, %v483_v52  ;;  %v572_v24 = vpop.permute.xlu1 %571  ;;  %v2339_v15 = vmax.f32 %v1618_v7, 0.0  ;;  %v974_v39 = vmul.f32 %v2340_v36, %v577_v35 }
  0xb9   : > { %v1822_v53 = vadd.f32 %v889_v43, %v483_v52  ;;  %v2336_v52 = vmax.f32 %v1612_v10, 0.0  ;;  %v614_v28 = vmul.f32 %v577_v35, %v2337_v3  ;;  %v615_v43 = vmul.f32 %v577_v35, %v2338_v63 }
  0xba   : > { %2333 = vst [vmem:[#allocation26_spill] sm:$0xff] %v1818_v25  ;;  %2334 = vst [vmem:[#allocation41_spill] sm:$0xff] %v1820_v41  ;;  %v616_v31 = vmul.f32 %v577_v35, %v2339_v15  ;;  %v2341_v26 = vmax.f32 %v1630_v1, 0.0  ;;  %v2342_v38 = vmax.f32 %v1632_v9, 0.0  ;;  %v2343_v10 = vmax.f32 %v1634_v27, 0.0  ;;  %v2393_v41 = vld [vmem:[#allocation55_spill] sm:$0xff] }
  0xbb   : > { %2335 = vst [vmem:[#allocation27_spill] sm:$0xff] %v1822_v53  ;;  %v613_v12 = vmul.f32 %v577_v35, %v2336_v52  ;;  %v2344_v11 = vmax.f32 %v1648_v0, 0.0  ;;  %v2345_v50 = vmax.f32 %v1650_v55, 0.0  ;;  %v2346_v7 = vmax.f32 %v1652_v17, 0.0  ;;  %v488_v55 = vpop.permute.xlu0 %487 }
  0xbc   : > { %v975_v40 = vmul.f32 %v2341_v26, %v577_v35  ;;  %v976_v37 = vmul.f32 %v2342_v38, %v577_v35  ;;  %v977_v52 = vmul.f32 %v2343_v10, %v577_v35  ;;  %v2347_v30 = vmax.f32 %v1654_v56, 0.0 }
  0xbd   : > { %v609_v3 = vmul.f32 %v572_v24, %v2344_v11  ;;  %v610_v63 = vmul.f32 %v572_v24, %v2345_v50  ;;  %v611_v15 = vmul.f32 %v572_v24, %v2346_v7  ;;  %v2348_v1 = vmax.f32 %v1668_v13, 0.0 }
  0xbe   : > { %v612_v36 = vmul.f32 %v572_v24, %v2347_v30  ;;  %v2349_v9 = vmax.f32 %v1670_v59, 0.0  ;;  %v2350_v27 = vmax.f32 %v1672_v21, 0.0  ;;  %v2351_v0 = vmax.f32 %v1674_v60, 0.0 }
  0xbf   : > { %v970_v26 = vmul.f32 %v2348_v1, %v572_v24  ;;  %v1864_v11 = vadd.f32 %v613_v12, %v609_v3  ;;  %v1866_v17 = vadd.f32 %v614_v28, %v610_v63  ;;  %v1868_v50 = vadd.f32 %v615_v43, %v611_v15  ;;  %v2360_v1 = vld [vmem:[#allocation12_spill] sm:$0xff] }
  0xc0   : > { %v971_v38 = vmul.f32 %v2349_v9, %v572_v24  ;;  %v972_v35 = vmul.f32 %v2350_v27, %v572_v24  ;;  %v973_v10 = vmul.f32 %v2351_v0, %v572_v24  ;;  %v1870_v56 = vadd.f32 %v616_v31, %v612_v36  ;;  %v2361_v9 = vld [vmem:[#allocation13_spill] sm:$0xff]  ;;  %v2362_v27 = vld [vmem:[#allocation14_spill] sm:$0xff] }
  0xc1   : > { %v1872_v13 = vadd.f32 %v974_v39, %v970_v26  ;;  %v449_v60 = vadd.f32 %v1677_v61, %v1705_v14  ;;  %v450_v24 = vadd.f32 %v1680_v62, %v1708_v54  ;;  %v451_v12 = vadd.f32 %v1683_v22, %v1711_v18  ;;  %v288_v14 = vpop.permute.xlu1 %287 }
  0xc2   : > { %v1874_v7 = vadd.f32 %v975_v40, %v971_v38  ;;  %v1876_v59 = vadd.f32 %v976_v37, %v972_v35  ;;  %v1878_v21 = vadd.f32 %v977_v52, %v973_v10  ;;  %v452_v31 = vadd.f32 %v1686_v23, %v1714_v58  ;;  %v2374_v52 = vld [vmem:[#allocation7_spill] sm:$0xff] }
  0xc3   : > { %v890_v40 = vadd.f32 %v1693_v19, %v1717_v8  ;;  %v891_v37 = vadd.f32 %v1696_v20, %v1720_v4  ;;  %v892_v39 = vadd.f32 %v1699_v6, %v1723_v57  ;;  %v893_v61 = vadd.f32 %v1702_v5, %v1726_v34  ;;  %v293_v6 = vpop.permute.xlu0 %292  ;;  %v2376_v57 = vld [vmem:[#allocation9_spill] sm:$0xff]  ;;  %v2377_v20 = vld [vmem:[#allocation10_spill] sm:$0xff]  ;;  %v2379_v34 = vld [vmem:[#allocation48_spill] sm:$0xff] }
  0xc4   : > { %v1896_v62 = vadd.f32 %v488_v55, %v449_v60  ;;  %v1898_v54 = vadd.f32 %v488_v55, %v450_v24  ;;  %v1900_v22 = vadd.f32 %v488_v55, %v451_v12  ;;  %v1902_v23 = vadd.f32 %v488_v55, %v452_v31 }
  0xc5   : > { %v1904_v58 = vadd.f32 %v890_v40, %v488_v55  ;;  %v1906_v8 = vadd.f32 %v891_v37, %v488_v55  ;;  %v1908_v4 = vadd.f32 %v892_v39, %v488_v55  ;;  %v1910_v18 = vadd.f32 %v893_v61, %v488_v55  ;;  %v374_v0 = vpop.permute.xlu1 %373  ;;  %v2371_v37 = vld [vmem:[#allocation4_spill] sm:$0xff] }
  0xc6   : > { %2352 = vst [vmem:[#allocation42_spill] sm:$0xff] %v1896_v62  ;;  %2353 = vst [vmem:[#allocation28_spill] sm:$0xff] %v1898_v54  ;;  %v1921_v3 = vmul.f32 %v1402_v44, %v288_v14  ;;  %v1924_v63 = vmul.f32 %v1404_v45, %v288_v14  ;;  %v1927_v15 = vmul.f32 %v1406_v46, %v288_v14  ;;  %v2391_v62 = vld [vmem:[#allocation54_spill] sm:$0xff] }
  0xc7   : > { %2354 = vst [vmem:[#allocation29_spill] sm:$0xff] %v1900_v22  ;;  %2355 = vst [vmem:[#allocation30_spill] sm:$0xff] %v1902_v23  ;;  %v1930_v30 = vmul.f32 %v1408_v47, %v288_v14  ;;  %v1933_v36 = vmul.f32 %v1410_v48, %v288_v14  ;;  %v1936_v26 = vmul.f32 %v2360_v1, %v288_v14  ;;  %v2389_v23 = vld [vmem:[#allocation53_spill] sm:$0xff] }
  0xc8   : > { %2356 = vst [vmem:[#allocation31_spill] sm:$0xff] %v1904_v58  ;;  %2357 = vst [vmem:[#allocation32_spill] sm:$0xff] %v1906_v8  ;;  %v1939_v38 = vmul.f32 %v2361_v9, %v288_v14  ;;  %v1942_v35 = vmul.f32 %v2362_v27, %v288_v14  ;;  %v1945_v10 = vmul.f32 %v1402_v44, %v293_v6  ;;  %v2373_v14 = vld [vmem:[#allocation6_spill] sm:$0xff]  ;;  %v2388_v8 = vld [vmem:[#allocation20_spill] sm:$0xff] }
  0xc9   : > { %2358 = vst [vmem:[#allocation43_spill] sm:$0xff] %v1908_v4  ;;  %2359 = vst [vmem:[#allocation33_spill] sm:$0xff] %v1910_v18  ;;  %v1948_v55 = vmul.f32 %v1404_v45, %v293_v6  ;;  %v1951_v60 = vmul.f32 %v1406_v46, %v293_v6  ;;  %v1954_v24 = vmul.f32 %v1408_v47, %v293_v6  ;;  %v493_v45 = vpop.permute.xlu0 %492  ;;  %v2372_v46 = vld [vmem:[#allocation5_spill] sm:$0xff]  ;;  %v2387_v4 = vld [vmem:[#allocation52_spill] sm:$0xff]  ;;  %v582_v25 = vpop.permute.xlu1 %581 }
  0xca   : > { %2363 = vst [vmem:[#allocation44_spill] sm:$0xff] %v1945_v10  ;;  %v1957_v12 = vmul.f32 %v1410_v48, %v293_v6  ;;  %v1960_v31 = vmul.f32 %v2360_v1, %v293_v6  ;;  %v1963_v40 = vmul.f32 %v2361_v9, %v293_v6  ;;  %v1966_v44 = vmul.f32 %v2362_v27, %v293_v6  ;;  %v2375_v48 = vld [vmem:[#allocation8_spill] sm:$0xff]  ;;  %v2378_v9 = vld [vmem:[#allocation11_spill] sm:$0xff]  ;;  %v2390_v22 = vld [vmem:[#allocation21_spill] sm:$0xff] }
  0xcb   : > { %2364 = vst [vmem:[#allocation34_spill] sm:$0xff] %v1948_v55  ;;  %2365 = vst [vmem:[#allocation45_spill] sm:$0xff] %v1951_v60  ;;  %v425_v39 = vmul.f32 %v2371_v37, %v374_v0  ;;  %v426_v61 = vmul.f32 %v2372_v46, %v374_v0  ;;  %v427_v47 = vmul.f32 %v2373_v14, %v374_v0  ;;  %v2380_v6 = vld [vmem:[#allocation16_spill] sm:$0xff]  ;;  %v2385_v55 = vld [vmem:[#allocation51_spill] sm:$0xff] }
  0xcc   : > { %2366 = vst [vmem:[#allocation35_spill] sm:$0xff] %v1954_v24  ;;  %2367 = vst [vmem:[#allocation46_spill] sm:$0xff] %v1957_v12  ;;  %v428_v43 = vmul.f32 %v2374_v52, %v374_v0  ;;  %v866_v28 = vmul.f32 %v2375_v48, %v374_v0  ;;  %v867_v1 = vmul.f32 %v2376_v57, %v374_v0  ;;  %v2383_v12 = vld [vmem:[#allocation50_spill] sm:$0xff]  ;;  %v2386_v10 = vld [vmem:[#allocation19_spill] sm:$0xff] }
  0xcd   : > { %2368 = vst [vmem:[#allocation36_spill] sm:$0xff] %v1960_v31  ;;  %2369 = vst [vmem:[#allocation47_spill] sm:$0xff] %v1963_v40  ;;  %v868_v19 = vmul.f32 %v2377_v20, %v374_v0  ;;  %v869_v5 = vmul.f32 %v2378_v9, %v374_v0  ;;  %v453_v27 = vadd.f32 %v2380_v6, %v2379_v34  ;;  %v2382_v40 = vld [vmem:[#allocation17_spill] sm:$0xff]  ;;  %v2384_v24 = vld [vmem:[#allocation18_spill] sm:$0xff] }
  0xce   : > { %2370 = vst [vmem:[#allocation37_spill] sm:$0xff] %v1966_v44  ;;  %v2381_v44 = vld [vmem:[#allocation49_spill] sm:$0xff]  ;;  %v455_v60 = vadd.f32 %v2384_v24, %v2383_v12  ;;  %v456_v18 = vadd.f32 %v2386_v10, %v2385_v55  ;;  %v894_v58 = vadd.f32 %v2388_v8, %v2387_v4  ;;  %v895_v54 = vadd.f32 %v2390_v22, %v2389_v23  ;;  %v2392_v0 = vld [vmem:[#allocation22_spill] sm:$0xff]  ;;  %v2394_v34 = vld [vmem:[#allocation23_spill] sm:$0xff] }
  0xcf   : > { %v454_v31 = vadd.f32 %v2382_v40, %v2381_v44  ;;  %v896_v53 = vadd.f32 %v2392_v0, %v2391_v62  ;;  %v897_v6 = vadd.f32 %v2394_v34, %v2393_v41  ;;  %v1992_v40 = vadd.f32 %v493_v45, %v453_v27  ;;  %v498_v62 = vpop.permute.xlu0 %497  ;;  %v2403_v12 = vld [vmem:[#allocation38_spill] sm:$0xff]  ;;  %v2405_v41 = vld [vmem:[#allocation24_spill] sm:$0xff] }
  0xd0   : > { %v1996_v24 = vadd.f32 %v493_v45, %v455_v60  ;;  %v1998_v10 = vadd.f32 %v493_v45, %v456_v18  ;;  %v2000_v55 = vadd.f32 %v894_v58, %v493_v45  ;;  %v2002_v8 = vadd.f32 %v895_v54, %v493_v45  ;;  %v2407_v58 = vld [vmem:[#allocation39_spill] sm:$0xff] }
  0xd1   : > { %v1994_v44 = vadd.f32 %v493_v45, %v454_v31  ;;  %v2004_v22 = vadd.f32 %v896_v53, %v493_v45  ;;  %v2006_v23 = vadd.f32 %v897_v6, %v493_v45  ;;  %v2400_v31 = vmax.f32 %v1768_v51, 0.0  ;;  %v2411_v51 = vld [vmem:[#allocation40_spill] sm:$0xff] }
  0xd2   : > { %2395 = vst [vmem:[#allocation12_spill] sm:$0xff] %v1998_v10  ;;  %2396 = vst [vmem:[#allocation13_spill] sm:$0xff] %v2000_v55  ;;  %v2401_v27 = vmax.f32 %v1770_v2, 0.0  ;;  %v2402_v34 = vmax.f32 %v1772_v42, 0.0  ;;  %v2404_v4 = vmax.f32 %v2403_v12, 0.0  ;;  %v2406_v18 = vmax.f32 %v2405_v41, 0.0  ;;  %v378_v2 = vpop.permute.xlu1 %377 }
  0xd3   : > { %2397 = vst [vmem:[#allocation14_spill] sm:$0xff] %v2002_v8  ;;  %2398 = vst [vmem:[#allocation4_spill] sm:$0xff] %v2004_v22  ;;  %v617_v45 = vmul.f32 %v582_v25, %v2400_v31  ;;  %v2408_v8 = vmax.f32 %v2407_v58, 0.0  ;;  %v2409_v22 = vld [vmem:[#allocation25_spill] sm:$0xff]  ;;  %v2412_v31 = vmax.f32 %v2411_v51, 0.0  ;;  %v2040_v58 = vpop.permute.xlu0 %502 }
  0xd4   : > { %2399 = vst [vmem:[#allocation5_spill] sm:$0xff] %v2006_v23  ;;  %v618_v0 = vmul.f32 %v582_v25, %v2401_v27  ;;  %v619_v6 = vmul.f32 %v582_v25, %v2402_v34  ;;  %v620_v60 = vmul.f32 %v582_v25, %v2404_v4  ;;  %v978_v55 = vmul.f32 %v2406_v18, %v582_v25 }
  0xd5   : > { %v979_v54 = vmul.f32 %v2408_v8, %v582_v25  ;;  %v2410_v53 = vmax.f32 %v2409_v22, 0.0  ;;  %v981_v10 = vmul.f32 %v2412_v31, %v582_v25  ;;  %v642_v27 = vadd.f32 %v1864_v11, %v617_v45 }
  0xd6   : > { %v655_v42 = vadd.f32 %v1866_v17, %v618_v0  ;;  %v668_v12 = vadd.f32 %v1868_v50, %v619_v6  ;;  %v681_v4 = vadd.f32 %v1870_v56, %v620_v60  ;;  %v1003_v41 = vadd.f32 %v1872_v13, %v978_v55 }
  0xd7   : > { %v980_v23 = vmul.f32 %v2410_v53, %v582_v25  ;;  %v1016_v18 = vadd.f32 %v1874_v7, %v979_v54  ;;  %v1042_v22 = vadd.f32 %v1878_v21, %v981_v10  ;;  %v2043_v25 = vmul.f32 %v2371_v37, %v378_v2  ;;  %v587_v10 = vpop.permute.xlu1 %586 }
  0xd8   : > { %v2046_v11 = vmul.f32 %v2372_v46, %v378_v2  ;;  %v2049_v17 = vmul.f32 %v2373_v14, %v378_v2  ;;  %v2052_v50 = vmul.f32 %v2374_v52, %v378_v2  ;;  %v2055_v56 = vmul.f32 %v2375_v48, %v378_v2 }
  0xd9   : > { %v1029_v8 = vadd.f32 %v1876_v59, %v980_v23  ;;  %v2058_v13 = vmul.f32 %v2376_v57, %v378_v2  ;;  %v2061_v7 = vmul.f32 %v2377_v20, %v378_v2  ;;  %v2064_v59 = vmul.f32 %v2378_v9, %v378_v2 }
  0xda   : > { %v457_v21 = vadd.f32 %v425_v39, %v1921_v3  ;;  %v458_v37 = vadd.f32 %v426_v61, %v1924_v63  ;;  %v459_v46 = vadd.f32 %v427_v47, %v1927_v15  ;;  %v460_v52 = vadd.f32 %v428_v43, %v1930_v30  ;;  %v602_v3 = vpop.permute.xlu0 %601 }
  0xdb   : > { %v898_v14 = vadd.f32 %v866_v28, %v1933_v36  ;;  %v899_v48 = vadd.f32 %v867_v1, %v1936_v26  ;;  %v900_v57 = vadd.f32 %v868_v19, %v1939_v38  ;;  %v901_v20 = vadd.f32 %v869_v5, %v1942_v35  ;;  %v592_v34 = vpop.permute.xlu1 %591 }
  0xdc   : > { %v529_v55 = vadd.f32 %v498_v62, %v457_v21  ;;  %v530_v9 = vadd.f32 %v498_v62, %v458_v37  ;;  %v531_v23 = vadd.f32 %v498_v62, %v459_v46  ;;  %v532_v60 = vadd.f32 %v498_v62, %v460_v52 }
  0xdd   : > { %v930_v39 = vadd.f32 %v898_v14, %v498_v62  ;;  %v931_v63 = vadd.f32 %v899_v48, %v498_v62  ;;  %v932_v61 = vadd.f32 %v900_v57, %v498_v62  ;;  %v933_v15 = vadd.f32 %v901_v20, %v498_v62  ;;  %v2418_v57 = vld [vmem:[#allocation26_spill] sm:$0xff] }
  0xde   : > { %v561_v47 = vmax.f32 %v529_v55, 0.0  ;;  %v562_v43 = vmax.f32 %v530_v9, 0.0  ;;  %v563_v30 = vmax.f32 %v531_v23, 0.0  ;;  %v564_v28 = vmax.f32 %v532_v60, 0.0  ;;  %v2420_v9 = vld [vmem:[#allocation41_spill] sm:$0xff] }
  0xdf   : > { %v962_v36 = vmax.f32 %v930_v39, 0.0  ;;  %v963_v26 = vmax.f32 %v931_v63, 0.0  ;;  %v964_v1 = vmax.f32 %v932_v61, 0.0  ;;  %v965_v19 = vmax.f32 %v933_v15, 0.0 }
  0xe0   : > { %v2074_v38 = vmul.f32 %v602_v3, %v561_v47  ;;  %v2076_v5 = vmul.f32 %v602_v3, %v562_v43  ;;  %v2078_v35 = vmul.f32 %v602_v3, %v563_v30  ;;  %v2080_v54 = vmul.f32 %v602_v3, %v564_v28  ;;  %v2424_v30 = vld [vmem:[#allocation42_spill] sm:$0xff] }
  0xe1   : > { %v2082_v53 = vmul.f32 %v962_v36, %v602_v3  ;;  %v2084_v45 = vmul.f32 %v963_v26, %v602_v3  ;;  %v2086_v62 = vmul.f32 %v964_v1, %v602_v3  ;;  %v2088_v0 = vmul.f32 %v965_v19, %v602_v3  ;;  %v2426_v36 = vld [vmem:[#allocation28_spill] sm:$0xff]  ;;  %v2428_v19 = vld [vmem:[#allocation29_spill] sm:$0xff] }
  0xe2   : > { %v2413_v6 = vmax.f32 %v1808_v29, 0.0  ;;  %v2414_v31 = vmax.f32 %v1810_v49, 0.0  ;;  %v2415_v21 = vmax.f32 %v1812_v32, 0.0  ;;  %v2416_v46 = vmax.f32 %v1814_v16, 0.0  ;;  %v2422_v29 = vld [vmem:[#allocation27_spill] sm:$0xff] }
  0xe3   : > { %v2417_v14 = vmax.f32 %v1816_v33, 0.0  ;;  %v2419_v20 = vmax.f32 %v2418_v57, 0.0  ;;  %v2421_v23 = vmax.f32 %v2420_v9, 0.0  ;;  %v2423_v3 = vmax.f32 %v2422_v29, 0.0 }
  0xe4   : > { %v621_v51 = vmul.f32 %v587_v10, %v2413_v6  ;;  %v622_v2 = vmul.f32 %v587_v10, %v2414_v31  ;;  %v623_v37 = vmul.f32 %v587_v10, %v2415_v21  ;;  %v624_v52 = vmul.f32 %v587_v10, %v2416_v46  ;;  %v2430_v21 = vld [vmem:[#allocation30_spill] sm:$0xff] }
  0xe5   : > { %v982_v48 = vmul.f32 %v2417_v14, %v587_v10  ;;  %v983_v55 = vmul.f32 %v2419_v20, %v587_v10  ;;  %v984_v60 = vmul.f32 %v2421_v23, %v587_v10  ;;  %v985_v39 = vmul.f32 %v2423_v3, %v587_v10  ;;  %v597_v14 = vpop.permute.xlu1 %596 }
  0xe6   : > { %v643_v49 = vadd.f32 %v642_v27, %v621_v51  ;;  %v656_v63 = vadd.f32 %v655_v42, %v622_v2  ;;  %v669_v61 = vadd.f32 %v668_v12, %v623_v37  ;;  %v682_v32 = vadd.f32 %v681_v4, %v624_v52  ;;  %v2432_v27 = vld [vmem:[#allocation31_spill] sm:$0xff]  ;;  %v2434_v4 = vld [vmem:[#allocation32_spill] sm:$0xff]  ;;  %v2438_v2 = vld [vmem:[#allocation33_spill] sm:$0xff] }
  0xe7   : > { %v1004_v15 = vadd.f32 %v1003_v41, %v982_v48  ;;  %v1017_v47 = vadd.f32 %v1016_v18, %v983_v55  ;;  %v1030_v16 = vadd.f32 %v1029_v8, %v984_v60  ;;  %v1043_v43 = vadd.f32 %v1042_v22, %v985_v39  ;;  %v2436_v8 = vld [vmem:[#allocation43_spill] sm:$0xff] }
  0xe8   : > { %v2425_v33 = vmax.f32 %v2424_v30, 0.0  ;;  %v2427_v26 = vmax.f32 %v2426_v36, 0.0  ;;  %v2429_v6 = vmax.f32 %v2428_v19, 0.0  ;;  %v2431_v46 = vmax.f32 %v2430_v21, 0.0  ;;  %v2447_v36 = vld [vmem:[#allocation14_spill] sm:$0xff] }
  0xe9   : > { %v2433_v42 = vmax.f32 %v2432_v27, 0.0  ;;  %v2435_v41 = vmax.f32 %v2434_v4, 0.0  ;;  %v2437_v22 = vmax.f32 %v2436_v8, 0.0  ;;  %v2439_v37 = vmax.f32 %v2438_v2, 0.0 }
  0xea   : > { %v625_v28 = vmul.f32 %v592_v34, %v2425_v33  ;;  %v626_v1 = vmul.f32 %v592_v34, %v2427_v26  ;;  %v627_v31 = vmul.f32 %v592_v34, %v2429_v6  ;;  %v628_v10 = vmul.f32 %v592_v34, %v2431_v46 }
  0xeb   : > { %v986_v12 = vmul.f32 %v2433_v42, %v592_v34  ;;  %v987_v18 = vmul.f32 %v2435_v41, %v592_v34  ;;  %v988_v51 = vmul.f32 %v2437_v22, %v592_v34  ;;  %v989_v52 = vmul.f32 %v2439_v37, %v592_v34  ;;  %v2456_v42 = vld [vmem:[#allocation35_spill] sm:$0xff]  ;;  %v607_v37 = vpop.permute.xlu1 %606 }
  0xec   : > { %v644_v48 = vadd.f32 %v643_v49, %v625_v28  ;;  %v657_v57 = vadd.f32 %v656_v63, %v626_v1  ;;  %v670_v20 = vadd.f32 %v669_v61, %v627_v31  ;;  %v683_v55 = vadd.f32 %v682_v32, %v628_v10  ;;  %v2443_v63 = vld [vmem:[#allocation12_spill] sm:$0xff]  ;;  %v2455_v10 = vld [vmem:[#allocation45_spill] sm:$0xff] }
  0xed   : > { %v2122_v9 = vadd.f32 %v1004_v15, %v986_v12  ;;  %v2124_v23 = vadd.f32 %v1017_v47, %v987_v18  ;;  %v2126_v60 = vadd.f32 %v1030_v16, %v988_v51  ;;  %v2128_v29 = vadd.f32 %v1043_v43, %v989_v52  ;;  %v2445_v15 = vld [vmem:[#allocation13_spill] sm:$0xff]  ;;  %v2449_v43 = vld [vmem:[#allocation4_spill] sm:$0xff] }
  0xee   : > { %v2440_v3 = vmax.f32 %v1992_v40, 0.0  ;;  %v2441_v30 = vmax.f32 %v1994_v44, 0.0  ;;  %v2442_v34 = vmax.f32 %v1996_v24, 0.0  ;;  %v2444_v61 = vmax.f32 %v2443_v63, 0.0  ;;  %v2451_v40 = vld [vmem:[#allocation5_spill] sm:$0xff]  ;;  %v2453_v44 = vld [vmem:[#allocation44_spill] sm:$0xff] }
  0xef   : > { %v2446_v28 = vmax.f32 %v2445_v15, 0.0  ;;  %v2448_v16 = vmax.f32 %v2447_v36, 0.0  ;;  %v2450_v1 = vmax.f32 %v2449_v43, 0.0  ;;  %v2452_v6 = vmax.f32 %v2451_v40, 0.0  ;;  %v2454_v24 = vld [vmem:[#allocation34_spill] sm:$0xff] }
  0xf0   : > { %v629_v39 = vmul.f32 %v597_v14, %v2440_v3  ;;  %v630_v33 = vmul.f32 %v597_v14, %v2441_v30  ;;  %v631_v49 = vmul.f32 %v597_v14, %v2442_v34  ;;  %v632_v32 = vmul.f32 %v597_v14, %v2444_v61 }
  0xf1   : > { %v990_v47 = vmul.f32 %v2446_v28, %v597_v14  ;;  %v991_v26 = vmul.f32 %v2448_v16, %v597_v14  ;;  %v992_v19 = vmul.f32 %v2450_v1, %v597_v14  ;;  %v993_v31 = vmul.f32 %v2452_v6, %v597_v14 }
  0xf2   : > { %v461_v21 = vadd.f32 %v2043_v25, %v2453_v44  ;;  %v462_v46 = vadd.f32 %v2046_v11, %v2454_v24  ;;  %v463_v27 = vadd.f32 %v2049_v17, %v2455_v10  ;;  %v464_v12 = vadd.f32 %v2052_v50, %v2456_v42 }
  0xf3   : > { %v645_v4 = vadd.f32 %v644_v48, %v629_v39  ;;  %v658_v41 = vadd.f32 %v657_v57, %v630_v33  ;;  %v671_v18 = vadd.f32 %v670_v20, %v631_v49  ;;  %v684_v8 = vadd.f32 %v683_v55, %v632_v32  ;;  %v2457_v55 = vld [vmem:[#allocation46_spill] sm:$0xff]  ;;  %v2458_v39 = vld [vmem:[#allocation36_spill] sm:$0xff]  ;;  %v2459_v33 = vld [vmem:[#allocation47_spill] sm:$0xff] }
  0xf4   : > { %v533_v22 = vadd.f32 %v2040_v58, %v461_v21  ;;  %v534_v51 = vadd.f32 %v2040_v58, %v462_v46  ;;  %v535_v2 = vadd.f32 %v2040_v58, %v463_v27  ;;  %v536_v25 = vadd.f32 %v2040_v58, %v464_v12 }
  0xf5   : > { %v646_v11 = vadd.f32 %v645_v4, %v2074_v38  ;;  %v659_v17 = vadd.f32 %v658_v41, %v2076_v5  ;;  %v672_v52 = vadd.f32 %v671_v18, %v2078_v35  ;;  %v685_v50 = vadd.f32 %v684_v8, %v2080_v54  ;;  %v2460_v38 = vld [vmem:[#allocation37_spill] sm:$0xff] }
  0xf6   : > { %v565_v14 = vmax.f32 %v533_v22, 0.0  ;;  %v566_v48 = vmax.f32 %v534_v51, 0.0  ;;  %v567_v57 = vmax.f32 %v535_v2, 0.0  ;;  %v568_v20 = vmax.f32 %v536_v25, 0.0 }
  0xf7   : > { %v902_v3 = vadd.f32 %v2055_v56, %v2457_v55  ;;  %v903_v30 = vadd.f32 %v2058_v13, %v2458_v39  ;;  %v904_v34 = vadd.f32 %v2061_v7, %v2459_v33  ;;  %v905_v5 = vadd.f32 %v2064_v59, %v2460_v38 }
  0xf8   : > { %v637_v49 = vmul.f32 %v607_v37, %v565_v14  ;;  %v638_v35 = vmul.f32 %v607_v37, %v566_v48  ;;  %v639_v63 = vmul.f32 %v607_v37, %v567_v57  ;;  %v640_v54 = vmul.f32 %v607_v37, %v568_v20 }
  0xf9   : > { %v934_v61 = vadd.f32 %v902_v3, %v2040_v58  ;;  %v935_v32 = vadd.f32 %v903_v30, %v2040_v58  ;;  %v936_v15 = vadd.f32 %v904_v34, %v2040_v58  ;;  %v937_v56 = vadd.f32 %v905_v5, %v2040_v58 }
  0xfa   : > { %v647_v28 = vadd.f32 %v646_v11, %v637_v49  ;;  %v660_v13 = vadd.f32 %v659_v17, %v638_v35  ;;  %v673_v36 = vadd.f32 %v672_v52, %v639_v63  ;;  %v686_v16 = vadd.f32 %v685_v50, %v640_v54  ;;  %v2461_v49 = vld [vmem:[#allocation15_spill] sm:$0xff] }
  0xfb   : > { %v966_v7 = vmax.f32 %v934_v61, 0.0  ;;  %v967_v43 = vmax.f32 %v935_v32, 0.0  ;;  %v968_v1 = vmax.f32 %v936_v15, 0.0  ;;  %v969_v59 = vmax.f32 %v937_v56, 0.0 }
  0xfc   : > { %v648_v40 = vrot.slane %v647_v28, 4  ;;  %v661_v6 = vrot.slane %v660_v13, 4  ;;  %v674_v44 = vrot.slane %v673_v36, 4  ;;  %v687_v21 = vrot.slane %v686_v16, 4 }
  0xfd   : > { %v998_v24 = vmul.f32 %v966_v7, %v607_v37  ;;  %v999_v46 = vmul.f32 %v967_v43, %v607_v37  ;;  %v1000_v10 = vmul.f32 %v968_v1, %v607_v37  ;;  %v1001_v27 = vmul.f32 %v969_v59, %v607_v37 }
  0xfe   : > { %v649_v42 = vadd.f32 %v648_v40, %v647_v28  ;;  %v662_v12 = vadd.f32 %v661_v6, %v660_v13  ;;  %v675_v4 = vadd.f32 %v674_v44, %v673_v36  ;;  %v688_v58 = vadd.f32 %v687_v21, %v686_v16 }
  0xff   : > { %v1006_v41 = vadd.f32 %v2122_v9, %v990_v47  ;;  %v1019_v18 = vadd.f32 %v2124_v23, %v991_v26  ;;  %v1032_v8 = vadd.f32 %v2126_v60, %v992_v19  ;;  %v1045_v22 = vadd.f32 %v2128_v29, %v993_v31 }
 0x100   : > { %v650_v51 = vrot.slane %v649_v42, 2  ;;  %v663_v2 = vrot.slane %v662_v12, 2  ;;  %v676_v25 = vrot.slane %v675_v4, 2  ;;  %v689_v11 = vrot.slane %v688_v58, 2 }
 0x101   : > { %v1007_v17 = vadd.f32 %v1006_v41, %v2082_v53  ;;  %v1020_v37 = vadd.f32 %v1019_v18, %v2084_v45  ;;  %v1033_v52 = vadd.f32 %v1032_v8, %v2086_v62  ;;  %v1046_v50 = vadd.f32 %v1045_v22, %v2088_v0 }
 0x102   : > { %v651_v14 = vadd.f32 %v650_v51, %v649_v42  ;;  %v664_v9 = vadd.f32 %v663_v2, %v662_v12  ;;  %v677_v47 = vadd.f32 %v676_v25, %v675_v4  ;;  %v690_v23 = vadd.f32 %v689_v11, %v688_v58 }
 0x103   : > { %v1008_v26 = vadd.f32 %v1007_v17, %v998_v24  ;;  %v1021_v60 = vadd.f32 %v1020_v37, %v999_v46  ;;  %v1034_v19 = vadd.f32 %v1033_v52, %v1000_v10  ;;  %v1047_v29 = vadd.f32 %v1046_v50, %v1001_v27 }
 0x104   : > { %v652_v31 = vrot.slane %v651_v14, 1  ;;  %v665_v48 = vrot.slane %v664_v9, 1  ;;  %v678_v57 = vrot.slane %v677_v47, 1  ;;  %v691_v20 = vrot.slane %v690_v23, 1 }
 0x105   : > { %v1009_v55 = vrot.slane %v1008_v26, 4  ;;  %v1022_v53 = vrot.slane %v1021_v60, 4  ;;  %v1035_v3 = vrot.slane %v1034_v19, 4  ;;  %v1048_v45 = vrot.slane %v1047_v29, 4 }
 0x106   : > { %v653_v39 = vadd.f32 %v652_v31, %v651_v14  ;;  %v666_v62 = vadd.f32 %v665_v48, %v664_v9  ;;  %v679_v30 = vadd.f32 %v678_v57, %v677_v47  ;;  %v692_v0 = vadd.f32 %v691_v20, %v690_v23 }
 0x107   : > { %v1010_v33 = vadd.f32 %v1009_v55, %v1008_v26  ;;  %v1023_v34 = vadd.f32 %v1022_v53, %v1021_v60  ;;  %v1036_v38 = vadd.f32 %v1035_v3, %v1034_v19  ;;  %v1049_v5 = vadd.f32 %v1048_v45, %v1047_v29 }
 0x108   : > { %v694_v35 = vadd.f32 %v2461_v49, %v653_v39  ;;  %v695_v63 = vadd.f32 %v2461_v49, %v666_v62  ;;  %v696_v54 = vadd.f32 %v2461_v49, %v679_v30  ;;  %v697_v61 = vadd.f32 %v2461_v49, %v692_v0 }
 0x109   : > { %v1011_v32 = vrot.slane %v1010_v33, 2  ;;  %v1024_v15 = vrot.slane %v1023_v34, 2  ;;  %v1037_v56 = vrot.slane %v1036_v38, 2  ;;  %v1050_v28 = vrot.slane %v1049_v5, 2 }
 0x10a   : > { %v1181_v13 = vclamps-f32 %v694_v35, 30.0  ;;  %v1182_v36 = vclamps-f32 %v695_v63, 30.0  ;;  %v1183_v16 = vclamps-f32 %v696_v54, 30.0  ;;  %v1184_v7 = vclamps-f32 %v697_v61, 30.0 }
 0x10b   : > { %v1012_v43 = vadd.f32 %v1011_v32, %v1010_v33  ;;  %v1025_v1 = vadd.f32 %v1024_v15, %v1023_v34  ;;  %v1038_v59 = vadd.f32 %v1037_v56, %v1036_v38  ;;  %v1051_v40 = vadd.f32 %v1050_v28, %v1049_v5  ;;  %v2462_v32 = vld [vmem:[#allocation3_spill] sm:$0xff] }
 0x10c   : > { %v706_v6 = vsub.f32 0.0, %v1181_v13  ;;  %v707_v44 = vsub.f32 0.0, %v1182_v36  ;;  %v708_v21 = vsub.f32 0.0, %v1183_v16  ;;  %v709_v24 = vsub.f32 0.0, %v1184_v7 }
 0x10d   : > { %v1013_v46 = vrot.slane %v1012_v43, 1  ;;  %v1026_v10 = vrot.slane %v1025_v1, 1  ;;  %v1039_v27 = vrot.slane %v1038_v59, 1  ;;  %v1052_v42 = vrot.slane %v1051_v40, 1 }
 0x10e   : > { %v710_v12 = vmul.f32 1.442695, %v706_v6  ;;  %v712_v4 = vmul.f32 1.442695, %v707_v44  ;;  %v714_v58 = vmul.f32 1.442695, %v708_v21 }
 0x10f   : > { %v716_v41 = vmul.f32 1.442695, %v709_v24  ;;  %v1014_v18 = vadd.f32 %v1013_v46, %v1012_v43  ;;  %v1027_v8 = vadd.f32 %v1026_v10, %v1025_v1  ;;  %v1040_v22 = vadd.f32 %v1039_v27, %v1038_v59 }
 0x110   : > { %1215 = vpow2.f32 %v710_v12  ;;  %v1053_v51 = vadd.f32 %v1052_v42, %v1051_v40  ;;  %v1257_v62 = vmov 1966171168   ;;  %v2463_v40 = vlaneseq }
 0x111   : > { %1217 = vpow2.f32 %v712_v4  ;;  %v1054_v2 = vadd.f32 %v1014_v18, %v2461_v49  ;;  %v1055_v25 = vadd.f32 %v1027_v8, %v2461_v49  ;;  %v1056_v11 = vadd.f32 %v1040_v22, %v2461_v49 }
 0x112   : > { %1219 = vpow2.f32 %v714_v58  ;;  %v1057_v17 = vadd.f32 %v1053_v51, %v2461_v49  ;;  %v737_v30 = vunpack.c.l.s4 %v1257_v62  ;;  %vm761_vm0 = vcmp.lt.s32.totalorder %v2463_v40, 512 }
 0x113   : > { %1221 = vpow2.f32 %v716_v41  ;;  %v1187_v37 = vclamps-f32 %v1054_v2, 30.0  ;;  %v1188_v52 = vclamps-f32 %v1055_v25, 30.0  ;;  %v1189_v50 = vclamps-f32 %v1056_v11, 30.0 }
 0x114   : > { %v1190_v14 = vclamps-f32 %v1057_v17, 30.0  ;;  %v738_v35 = vunpack.c.0.s8 %v737_v30 }
 0x115   : > { %v1066_v9 = vsub.f32 0.0, %v1187_v37  ;;  %v1067_v47 = vsub.f32 0.0, %v1188_v52  ;;  %v1068_v23 = vsub.f32 0.0, %v1189_v50 }
 0x116   : > { %v1069_v26 = vsub.f32 0.0, %v1190_v14  ;;  %v741_v15 = vsub.s32 %v738_v35, %v2462_v32 }
 0x117   : > { %v1070_v60 = vmul.f32 1.442695, %v1066_v9  ;;  %v1072_v19 = vmul.f32 1.442695, %v1067_v47  ;;  %v1074_v29 = vmul.f32 1.442695, %v1068_v23 }
 0x118   : > { %v1076_v31 = vmul.f32 1.442695, %v1069_v26 }
 0x119   : > { %1223 = vpow2.f32 %v1070_v60 }
 0x11a   : > { %1225 = vpow2.f32 %v1072_v19 }
 0x11b   : > { %1227 = vpow2.f32 %v1074_v29 }
 0x11c   : > { %1229 = vpow2.f32 %v1076_v31 }
 0x11d   : > { %v1216_v48 = vpop.eup %1215 }
 0x11e   : > { %v1218_v57 = vpop.eup %1217  ;;  %v718_v20 = vadd.f32 1.0, %v1216_v48 }
 0x11f   : > { %v1220_v55 = vpop.eup %1219  ;;  %v719_v53 = vadd.f32 1.0, %v1218_v57 }
 0x120   : > { %v1222_v3 = vpop.eup %1221  ;;  %v720_v45 = vadd.f32 1.0, %v1220_v55  ;;  %1231 = vrcp.f32 %v718_v20 }
 0x121   : > { %v721_v39 = vadd.f32 1.0, %v1222_v3  ;;  %1233 = vrcp.f32 %v719_v53 }
 0x122   : > { %1235 = vrcp.f32 %v720_v45 }
 0x123   : > { %1237 = vrcp.f32 %v721_v39 }
 0x126   : > { %v1224_v0 = vpop.eup %1223 }
 0x127   : > { %v1226_v33 = vpop.eup %1225  ;;  %v1078_v34 = vadd.f32 1.0, %v1224_v0 }
 0x128   : > { %v1228_v38 = vpop.eup %1227  ;;  %v1079_v5 = vadd.f32 1.0, %v1226_v33 }
 0x129   : > { %v1230_v49 = vpop.eup %1229  ;;  %v1080_v63 = vadd.f32 1.0, %v1228_v38  ;;  %1239 = vrcp.f32 %v1078_v34 }
 0x12a   : > { %v1081_v54 = vadd.f32 1.0, %v1230_v49  ;;  %1241 = vrcp.f32 %v1079_v5 }
 0x12b   : > { %1243 = vrcp.f32 %v1080_v63 }
 0x12c   : > { %1245 = vrcp.f32 %v1081_v54 }
 0x12d   : > { %v1232_v61 = vpop.eup %1231 }
 0x12e   : > { %v1234_v56 = vpop.eup %1233 }
 0x12f   : > { %v1236_v28 = vpop.eup %1235  ;;  %v734_v13 = vcombine.low %v1232_v61, %v1234_v56 }
 0x130   : > { %v1238_v36 = vpop.eup %1237 }
 0x131   : > { %v735_v16 = vcombine.low %v1236_v28, %v1238_v36  ;;  %v742_v7 = vrot.slane %v734_v13, %v741_v15 }
 0x133   : > { %v749_v43 = vrot.slane %v735_v16, %v741_v15 }
 0x135   : > { %v750_v1 = vcombine.low %v742_v7, %v749_v43 }
 0x136   : > { %v1240_v59 = vpop.eup %1239 }
 0x137   : > { %v1242_v6 = vpop.eup %1241  ;;  %v757_v44 = vrot.slane %v750_v1, %v741_v15 }
 0x138   : > { %v1244_v21 = vpop.eup %1243  ;;  %v1094_v24 = vcombine.low %v1240_v59, %v1242_v6 }
 0x139   : > { %v1246_v46 = vpop.eup %1245  ;;  %763 = vst.msk [vmem:[%s225_s28] sm:$0xf] %vm761_vm0, %v757_v44 }
 0x13a   : > { %v1095_v10 = vcombine.low %v1244_v21, %v1246_v46  ;;  %v1102_v27 = vrot.slane %v1094_v24, %v741_v15 }
 0x13c   : > { %v1109_v42 = vrot.slane %v1095_v10, %v741_v15 }
 0x13e   : > { %v1110_v12 = vcombine.low %v1102_v27, %v1109_v42 }
 0x140   : > { %v1117_v4 = vrot.slane %v1110_v12, %v741_v15 }
 0x142   : > { %1191 = vst.msk [vmem:[%s225_s28 + $0x4] sm:$0xf] %vm761_vm0, %v1117_v4 }
 0x143 PF: > { %s16_s20 = sadd.s32 1, %s1253_s20  }
 0x144   : > { %p13_p4 = scmp.ge.s32.totalorder %s16_s20, 4  }
 0x146   :  { %15 = sbr.rel (!%p13_p4) target bundleno = 2 (0x2), region = 74 }

</bundles_post_ra>
